<compile_context>
chip_gen: v7x
topology: tpu7x:2x2x1
jax: 0.10.0
libtpu: 0.0.40
codegen_flags: <defaults>
</compile_context>

<pallas_src>
import functools

import jax
import jax.numpy as jnp
from jax.experimental import pallas as pl
from jax.experimental.pallas import tpu as pltpu

_LANES = 128
_MAX_BLOCK_ROWS = 4096          # 4096 x 128 f32 = 2 MiB per block
_EPS = 1e-5


def _fused_kernel(x_ref, o_ref, scale_ref, acc_ref, s_ref, *,
                  bitwidth, block_rows, total_rows, mask_tail):
    """Phase 0: abs-max reduction; phase 1: fixed-point quantization."""
    p = pl.program_id(0)     # phase axis: 0 = abs-max, 1 = quantize
    i = pl.program_id(1)     # tile index
    n_tiles = pl.num_programs(1)

    @pl.when((p == 0) & (i == 0))
    def _init():
        acc_ref[...] = jnp.zeros_like(acc_ref)

    @pl.when(p == 0)
    def _absmax_phase():
        xa = jnp.abs(x_ref[...].astype(jnp.float32))
        if mask_tail:
            # Partial last block: rows past the real data hold undefined VMEM
            # contents -> mask them out of the reduction.
            row = (jax.lax.broadcasted_iota(jnp.int32, xa.shape, 0)
                   + i * block_rows)
            xa = jnp.where(row < total_rows, xa, 0.0)
        # Fold (block_rows, 128) -> (8, 128) with elementwise maxes (VPU only);
        # the single cross-lane/sublane reduce happens once in the epilogue.
        part = jnp.max(xa.reshape(-1, 8, _LANES), axis=0)
        acc_ref[...] = jnp.maximum(acc_ref[...], part)

        @pl.when(i == n_tiles - 1)
        def _finalize():
            max_abs = jnp.maximum(jnp.max(acc_ref[...]), jnp.float32(_EPS))
            scale = jnp.ceil(jnp.log2(max_abs))
            s_ref[0] = max_abs
            s_ref[1] = scale
            scale_ref[...] = scale.reshape(1, 1)

    @pl.when(p == 1)
    def _quantize_phase():
        scale = s_ref[1]
        bw = jnp.float32(bitwidth)
        step = jnp.exp2(scale - (bw - 1.0))
        inv_step = jnp.exp2((bw - 1.0) - scale)   # exact reciprocal (pow2)
        lo = -jnp.exp2(scale)
        hi = -lo - step
        xf = x_ref[...].astype(jnp.float32)
        q = jnp.round(xf * inv_step) * step
        o_ref[...] = jnp.clip(q, lo, hi).astype(o_ref.dtype)


def activation_fix_forward(x, *, bitwidth=8):
    """Replicates Activation_fix.forward (FIX_AUTO quantization of `inputs`).

    Returns (quantized_activation, scale) — `scale` mirrors the module's
    `activation_fp_scale` buffer update.
    """
    orig_shape = x.shape
    orig_dtype = x.dtype
    n = x.size

    # Sublane alignment for the native dtype (8 rows for 4B, 16 for 2B, 32 for 1B).
    itemsize = jnp.dtype(orig_dtype).itemsize
    row_align = 8 * max(1, 4 // max(1, itemsize))
    align_elems = row_align * _LANES

    flat = x.reshape(-1)                       # layout-free: reshape is a view
    pad = (-n) % align_elems
    if pad:                                     # only when not lane-aligned
        flat = jnp.pad(flat, (0, pad))          # zeros cannot change max(|x|)
    rows = (n + pad) // _LANES
    x2d = flat.reshape(rows, _LANES)

    block_rows = min(rows, _MAX_BLOCK_ROWS)
    num_tiles = pl.cdiv(rows, block_rows)
    mask_tail = (rows % block_rows) != 0

    kernel = functools.partial(
        _fused_kernel, bitwidth=bitwidth, block_rows=block_rows,
        total_rows=rows, mask_tail=mask_tail)

    out2d, scale = pl.pallas_call(
        kernel,
        grid=(2, num_tiles),
        in_specs=[pl.BlockSpec((block_rows, _LANES), lambda p, i: (i, 0))],
        out_specs=[
            # Phase 0: stay parked on block 0 (no index change -> no garbage
            # writeback); phase 1: stream block i.
            pl.BlockSpec((block_rows, _LANES), lambda p, i: (p * i, 0)),
            pl.BlockSpec((1, 1), lambda p, i: (0, 0)),
        ],
        out_shape=[
            jax.ShapeDtypeStruct((rows, _LANES), orig_dtype),
            jax.ShapeDtypeStruct((1, 1), jnp.float32),
        ],
        scratch_shapes=[
            pltpu.VMEM((8, _LANES), jnp.float32),   # lane-dense running max
            pltpu.SMEM((2,), jnp.float32),          # [max_abs, scale] scalars
        ],
        compiler_params=pltpu.CompilerParams(
            dimension_semantics=("arbitrary", "arbitrary"),
            vmem_limit_bytes=32 * 1024 * 1024),
    )(x2d)

    if pad:
        out = out2d.reshape(-1)[:n].reshape(orig_shape)
    else:
        out = out2d.reshape(orig_shape)
    return out, scale[0, 0]


def _reference(x, bitwidth=8):
    """Pure-JAX reference of nics_fix_pt FIX_AUTO quantization."""
    x = x.astype(jnp.float32)
    max_abs = jnp.maximum(jnp.max(jnp.abs(x)), _EPS)
    scale = jnp.ceil(jnp.log2(max_abs))
    step = jnp.exp2(scale - (bitwidth - 1.0))
    minimum = -jnp.exp2(scale)
    maximum = -minimum - step
    return jnp.clip(jnp.round(x / step) * step, minimum, maximum)


if __name__ == "__main__":
    key = jax.random.PRNGKey(0)
    # NCHW activation, small shapes (batch=2, channels=4, spatial=16).
    x = jax.random.normal(key, (2, 4, 16, 16), dtype=jnp.float32) * 3.0

    # Deterministic "fix config" (what nf_fix_params would carry): bitwidth=8.
    out, scale = activation_fix_forward(x, bitwidth=8)
    out = jax.block_until_ready(out)

    ref = _reference(x, bitwidth=8)
    ref_scale = jnp.ceil(jnp.log2(jnp.maximum(jnp.max(jnp.abs(x)), _EPS)))
    assert out.shape == x.shape and out.dtype == x.dtype
    assert jnp.allclose(out, ref, atol=1e-6), "mismatch vs reference"
    assert jnp.allclose(scale, ref_scale), "scale mismatch vs reference"

    print("KERNEL_OK")
</pallas_src>

<mosaic_0001>
module attributes {stable_mosaic.version = 11 : i64} {
  func.func @_fused_kernel(%arg0: i32, %arg1: i32, %arg2: memref<16x128xf32, #tpu.memory_space<vmem>>, %arg3: memref<16x128xf32, #tpu.memory_space<vmem>>, %arg4: memref<1x1xf32, #tpu.memory_space<vmem>>, %arg5: memref<8x128xf32, #tpu.memory_space<vmem>>, %arg6: memref<2xf32, #tpu.memory_space<smem>>) attributes {dimension_semantics = [#tpu.dimension_semantics<arbitrary>, #tpu.dimension_semantics<arbitrary>], iteration_bounds = array<i64: 2, 1>, scalar_prefetch = 0 : i64, scratch_operands = 2 : i64, tpu.core_type = #tpu.core_type<tc>, window_params = [{transform_indices = @transform_0, window_bounds = array<i64: 16, 128>}, {transform_indices = @transform_1, window_bounds = array<i64: 16, 128>}, {pipeline_mode = #tpu.pipeline_mode<synchronous>, transform_indices = @transform_2, window_bounds = array<i64: 1, 1>}]} {
    %c0_i32 = arith.constant 0 : i32
    %0 = arith.cmpi eq, %arg0, %c0_i32 : i32
    %c0_i32_0 = arith.constant 0 : i32
    %1 = arith.cmpi eq, %arg1, %c0_i32_0 : i32
    %2 = arith.andi %0, %1 : i1
    %3 = arith.extui %2 : i1 to i32
    %c0_i32_1 = arith.constant 0 : i32
    %4 = arith.cmpi ne, %3, %c0_i32_1 : i32
    scf.if %4 {
      %cst = arith.constant 0.000000e+00 : f32
      %11 = vector.broadcast %cst : f32 to vector<8x128xf32>
      %c0 = arith.constant 0 : index
      %c0_5 = arith.constant 0 : index
      %12 = vector.load %arg5[%c0, %c0_5] : memref<8x128xf32, #tpu.memory_space<vmem>>, vector<8x128xf32>
      tpu.vector_store %arg5[%c0, %c0_5], %11 {strides = array<i32>} : memref<8x128xf32, #tpu.memory_space<vmem>>, vector<8x128xf32>,
    } else {
    }
    %c0_i32_2 = arith.constant 0 : i32
    %5 = arith.cmpi eq, %arg0, %c0_i32_2 : i32
    %6 = arith.extui %5 : i1 to i32
    %c0_i32_3 = arith.constant 0 : i32
    %7 = arith.cmpi ne, %6, %c0_i32_3 : i32
    scf.if %7 {
      %c0 = arith.constant 0 : index
      %c0_5 = arith.constant 0 : index
      %11 = vector.load %arg2[%c0, %c0_5] : memref<16x128xf32, #tpu.memory_space<vmem>>, vector<16x128xf32>
      %12 = math.absf %11 : vector<16x128xf32>
      %13 = vector.shape_cast %12 : vector<16x128xf32> to vector<2x8x128xf32>
      %cst = arith.constant dense<0xFF800000> : vector<8x128xf32>
      %14 = vector.multi_reduction <maximumf>, %13, %cst [0] : vector<2x8x128xf32> to vector<8x128xf32>
      %c0_6 = arith.constant 0 : index
      %c0_7 = arith.constant 0 : index
      %15 = vector.load %arg5[%c0_6, %c0_7] : memref<8x128xf32, #tpu.memory_space<vmem>>, vector<8x128xf32>
      %16 = arith.maximumf %15, %14 : vector<8x128xf32>
      %c0_8 = arith.constant 0 : index
      %c0_9 = arith.constant 0 : index
      %17 = vector.load %arg5[%c0_8, %c0_9] : memref<8x128xf32, #tpu.memory_space<vmem>>, vector<8x128xf32>
      tpu.vector_store %arg5[%c0_8, %c0_9], %16 {strides = array<i32>} : memref<8x128xf32, #tpu.memory_space<vmem>>, vector<8x128xf32>,
      %c0_i32_10 = arith.constant 0 : i32
      %18 = arith.cmpi eq, %arg1, %c0_i32_10 : i32
      %19 = arith.extui %18 : i1 to i32
      %c0_i32_11 = arith.constant 0 : i32
      %20 = arith.cmpi ne, %19, %c0_i32_11 : i32
      scf.if %20 {
        %c0_12 = arith.constant 0 : index
        %c0_13 = arith.constant 0 : index
        %21 = vector.load %arg5[%c0_12, %c0_13] : memref<8x128xf32, #tpu.memory_space<vmem>>, vector<8x128xf32>
        %22 = vector.shape_cast %21 : vector<8x128xf32> to vector<1x8x128xf32>
        %cst_14 = arith.constant dense<0xFF800000> : vector<1xf32>
        %23 = vector.multi_reduction <maximumf>, %22, %cst_14 [1, 2] : vector<1x8x128xf32> to vector<1xf32>
        %24 = vector.shape_cast %23 : vector<1xf32> to vector<1x1x1xf32>
        %25 = vector.extract %24[0, 0, 0] : f32 from vector<1x1x1xf32>
        %cst_15 = arith.constant 9.99999974E-6 : f32
        %26 = arith.maximumf %25, %cst_15 : f32
        %27 = math.log %26 : f32
        %cst_16 = arith.constant 2.000000e+00 : f32
        %28 = math.log %cst_16 : f32
        %29 = arith.divf %27, %28 : f32
        %30 = math.ceil %29 : f32
        %c0_17 = arith.constant 0 : index
        %31 = memref.load %arg6[%c0_17] : memref<2xf32, #tpu.memory_space<smem>>
        memref.store %26, %arg6[%c0_17] : memref<2xf32, #tpu.memory_space<smem>>
        %c1 = arith.constant 1 : index
        %32 = memref.load %arg6[%c1] : memref<2xf32, #tpu.memory_space<smem>>
        memref.store %30, %arg6[%c1] : memref<2xf32, #tpu.memory_space<smem>>
        %33 = vector.broadcast %30 : f32 to vector<1x1xf32>
        %c0_18 = arith.constant 0 : index
        %c0_19 = arith.constant 0 : index
        %34 = vector.load %arg4[%c0_18, %c0_19] : memref<1x1xf32, #tpu.memory_space<vmem>>, vector<1x1xf32>
        tpu.vector_store %arg4[%c0_18, %c0_19], %33 {strides = array<i32>} : memref<1x1xf32, #tpu.memory_space<vmem>>, vector<1x1xf32>,
      } else {
      }
    } else {
    }
    %c1_i32 = arith.constant 1 : i32
    %8 = arith.cmpi eq, %arg0, %c1_i32 : i32
    %9 = arith.extui %8 : i1 to i32
    %c0_i32_4 = arith.constant 0 : i32
    %10 = arith.cmpi ne, %9, %c0_i32_4 : i32
    scf.if %10 {
      %c1 = arith.constant 1 : index
      %11 = memref.load %arg6[%c1] : memref<2xf32, #tpu.memory_space<smem>>
      %cst = arith.constant 8.000000e+00 : f32
      %cst_5 = arith.constant 1.000000e+00 : f32
      %12 = arith.subf %cst, %cst_5 : f32
      %13 = arith.subf %11, %12 : f32
      %14 = math.exp2 %13 : f32
      %cst_6 = arith.constant 8.000000e+00 : f32
      %cst_7 = arith.constant 1.000000e+00 : f32
      %15 = arith.subf %cst_6, %cst_7 : f32
      %16 = arith.subf %15, %11 : f32
      %17 = math.exp2 %16 : f32
      %18 = math.exp2 %11 : f32
      %cst_8 = arith.constant 0.000000e+00 : f32
      %19 = arith.subf %cst_8, %18 : f32
      %cst_9 = arith.constant 0.000000e+00 : f32
      %20 = arith.subf %cst_9, %19 : f32
      %21 = arith.subf %20, %14 : f32
      %c0 = arith.constant 0 : index
      %c0_10 = arith.constant 0 : index
      %22 = vector.load %arg2[%c0, %c0_10] : memref<16x128xf32, #tpu.memory_space<vmem>>, vector<16x128xf32>
      %23 = vector.broadcast %17 : f32 to vector<16x128xf32>
      %24 = arith.mulf %22, %23 : vector<16x128xf32>
      %25 = math.roundeven %24 : vector<16x128xf32>
      %26 = vector.broadcast %14 : f32 to vector<16x128xf32>
      %27 = arith.mulf %25, %26 : vector<16x128xf32>
      %28 = vector.broadcast %19 : f32 to vector<16x128xf32>
      %29 = arith.maximumf %28, %27 : vector<16x128xf32>
      %30 = vector.broadcast %21 : f32 to vector<16x128xf32>
      %31 = arith.minimumf %30, %29 : vector<16x128xf32>
      %c0_11 = arith.constant 0 : index
      %c0_12 = arith.constant 0 : index
      %32 = vector.load %arg3[%c0_11, %c0_12] : memref<16x128xf32, #tpu.memory_space<vmem>>, vector<16x128xf32>
      tpu.vector_store %arg3[%c0_11, %c0_12], %31 {strides = array<i32>} : memref<16x128xf32, #tpu.memory_space<vmem>>, vector<16x128xf32>,
    } else {
    }
    return
  }
  func.func @transform_0(%arg0: i32, %arg1: i32) -> (i32, i32) {
    %c0_i32 = arith.constant 0 : i32
    %c0_i32_0 = arith.constant 0 : i32
    return %arg1, %c0_i32 : i32, i32
  }
  func.func @transform_1(%arg0: i32, %arg1: i32) -> (i32, i32) {
    %0 = arith.muli %arg0, %arg1 : i32
    %c0_i32 = arith.constant 0 : i32
    %c0_i32_0 = arith.constant 0 : i32
    return %0, %c0_i32 : i32, i32
  }
  func.func @transform_2(%arg0: i32, %arg1: i32) -> (i32, i32) {
    %c0_i32 = arith.constant 0 : i32
    %c0_i32_0 = arith.constant 0 : i32
    %c0_i32_1 = arith.constant 0 : i32
    return %c0_i32, %c0_i32_0 : i32, i32
  }
}

</mosaic_0001>

<bundles_post_ra>
// kernel: tpu_custom_call.1
= control target key start
LH: loop header
LB: loop body
LE: loop exit
PB: predicated region body
PF: predicated region fallthrough
CT: control target
= control target key end

     0   :  { %8 = vsyncpa [#allocation5], 0  ;;  %s715_s0 = inlined_call_operand.hbm [shape: f32[16,128], index: 0, kind: input, shape index: {}]   ;;  %s716_s1 = inlined_call_operand.hbm [shape: f32[16,128], index: 1, kind: output, shape index: {0}]   ;;  %s717_s2 = inlined_call_operand.hbm [shape: f32[1,1], index: 2, kind: output, shape index: {1}]  }
   0x1   :  { %9 = vsyncpa [#allocation6], 0 }
   0x2   :  { %11 = vsyncpa [#allocation6 + $0x1], 0 }
   0x3   :  { %12 = vsyncpa [#allocation9], 0  ;;  %s592_s9 = smov 0   ;;  %s594_s10 = smov 0  }
   0x4   :  { %s596_s11 = smov 0  }
   0x5 LB: > { %s354_s12 = sadd.s32 4294967295, %s566_s11   ;;  %s355_s13 = sadd.s32 4294967294, %s566_s11   ;;  %s566_s11 = sphi %s596_s11, %s18_s11   ;;  %s562_s10 = sphi %s594_s10, %s728_s10   ;;  %s558_s9 = sphi %s592_s9, %s727_s9  }
   0x6   : > { %s30_s14 = sadd.s32 1, %s562_s10  ;;  %p356_p0 = scmp.ge.s32.totalorder %s566_s11, 1 }
   0x7   : > { %p32_p1 = scmp.ge.s32.totalorder %s30_s14, 2  ;;  %p110_p2 = scmp.lt.s32.totalorder %s566_s11, 3 }
   0x8   : > { %p614_p3 = scmp.eq.s32.totalorder %s354_s12, 0  ;;  %s568_s17 = smov [#allocation4]  }
   0x9   : > { %s730_s14 = smov (%p32_p1, %s30_s14), 0  ;;  %p620_p4 = pnand %p356_p0, %p110_p2 }
   0xa   : > { %s721_s15 = scalar_select %p614_p3, 1, 0 }
   0xb   : > { %s722_s16 = scalar_select %p620_p4, 1, 0 }
   0xc   : > { %s125_s18 = sshll.u32 %s568_s17, 4  ;;  %p396_p5 = pneg %p620_p4  ;;  %s126_s18 = int_to_ptr.vmem [resolvable:$true] %s125_s18 }
   0xd   : > { %s452_s22 = scalar_lea.hbm %s715_s0, 256 }
   0xe   : > { %p628_p6 = pnand %p614_p3, %p396_p5  ;;  %p453_p7 = scmp.ne.s32.totalorder %s715_s0, %s452_s22 }
   0xf   : > { %p459_p11 = scmp.lt.u32.totalorder %s452_s22, %s715_s0 }
  0x10   : > { %p454_p8 = pneg %p628_p6 }
  0x12   : > { %p455_p9 = pnand %p454_p8, %p453_p7 }
  0x14   : > { %p456_p10 = pneg %p455_p9 }
  0x16   : > { %p461_p12 = pnand %p459_p11, %p456_p10 }
  0x18   : > { %464 = shalt.err (!%p461_p12)
}
  0x19   : > { %s465_s27 = scalar_lea.vmem %s126_s18, 256  ;;  %p473_p2 = scmp.lt.s32.totalorder %s126_s18, %s126_s18 }
  0x1a   : > { %p466_p13 = scmp.ne.s32.totalorder %s126_s18, %s465_s27  ;;  %p474_p5 = scmp.lt.s32.totalorder %s465_s27, %s465_s27 }
  0x1c   : > { %p468_p0 = pnand %p466_p13, %p454_p8  ;;  %p475_p3 = por %p474_p5, %p473_p2 }
  0x1e   : > { %p469_p1 = pneg %p468_p0 }
  0x20   : > { %p476_p4 = pnand %p475_p3, %p469_p1 }
  0x22   : > { %479 = shalt.err (!%p476_p4)
}
  0x23   : > { %s569_s28 = smov 128   ;;  %s570_s29 = smov 8  }
  0x24   : > { %399 = dma.hbm_to_vmem [thread:$0]  (!%p628_p6), %s715_s0, 256, %s126_s18, [#allocation5], %s569_s28, %s569_s28, %s570_s29  }
  0x25   : > { %p724_p7 = scmp.ne.s32.totalorder %s722_s16, 0 }
  0x26   : > { %p725_p9 = scmp.ne.s32.totalorder (!%p724_p7), %s721_s15, 0 }
  0x27   : > { %141 = sbr.rel (%p724_p7) target bundleno = 471 (0x1d7), region = 24 }
  0x2e   : > { %545 = dma.done.wait (%p725_p9), [#allocation5], 256  }
  0x2f   : > { %547 = vsyncadd (%p725_p9), [#allocation5], 4294967040  ;;  %p161_p3 = scmp.eq.s32.totalorder %s558_s9, 0 }
  0x30   : > { %v571_v0 = vmov (%p161_p3), 0.0  }
  0x31   : > { %166 = sbr.rel (!%p161_p3) target bundleno = 56 (0x38), region = 32  ;;  %167 = vst [vmem:[#allocation2] sm:$0xff] (%p161_p3), %v571_v0 }
  0x38 PF: > { %p361_p4 = scmp.ne.s32.totalorder %s558_s9, 0 }
  0x39   : > { %v171_v1 = vld [vmem:[#allocation4] sm:$0xff] (!%p361_p4)  ;;  %v172_v2 = vld [vmem:[#allocation4 + $0x8] sm:$0xff] (!%p361_p4)  ;;  %v176_v5 = vld [vmem:[#allocation2] sm:$0xff] (!%p361_p4)  ;;  %s572_s5 = smov (!%p361_p4), 1e-05   ;;  %vm206_vm0 = vcmask (!%p361_p4), 0  }
  0x3a   : > { %170 = sbr.rel (%p361_p4) target bundleno = 338 (0x152), region = 36  ;;  %v173_v3 = vand.u32 (!%p361_p4), 2147483647, %v171_v1  ;;  %v174_v4 = vand.u32 (!%p361_p4), 2147483647, %v172_v2 }
  0x3c   : > { %v175_v6 = vmax.f32.f32 (!%p361_p4), %v173_v3, %v174_v4 }
  0x3e   : > { %v177_v7 = vmax.f32 (!%p361_p4), %v176_v5, %v175_v6 }
  0x40   : > { %178 = vst [vmem:[#allocation2] sm:$0xff] (!%p361_p4), %v177_v7  ;;  %183 = vmax.xlane.f32.xlu0 (!%p361_p4), %v177_v7 }
  0xcd   : > { %v184_v8 = vpop.xlane.xlu0 %183 }
  0xce   : > { %v185_v9 = vrot.slane %v184_v8, 4 }
  0xd0   : > { %v186_v10 = vmax.f32 %v184_v8, %v185_v9 }
  0xd2   : > { %v187_v11 = vrot.slane %v186_v10, 2 }
  0xd4   : > { %v188_v12 = vmax.f32 %v186_v10, %v187_v11 }
  0xd6   : > { %v189_v13 = vrot.slane %v188_v12, 1 }
  0xd8   : > { %v190_v14 = vmax.f32 %v188_v12, %v189_v13 }
  0xda   : > { %372 = vpush %v190_v14 }
 0x10b   : > { %s373_s4 = spop %372 }
 0x10c   : > { %s192_s6 = smax.f32 %s572_s5, %s373_s4 }
 0x10d   : > { %v193_v15 = vstv %s192_s6  ;;  %202 = sst [smem:[#allocation3]] %s192_s6 }
 0x10e   : > { %444 = vlog2.f32 %v193_v15 }
 0x118   : > { %v445_v16 = vpop.eup %444 }
 0x119   : > { %v195_v17 = vmul.f32 0.6931472, %v445_v16 }
 0x11b   : > { %374 = vpush %v195_v17 }
 0x14c   : > { %s375_s7 = spop %374 }
 0x14d   : > { %s199_s8 = smul.f32 1.442695, %s375_s7 }
 0x14f   : > { %s200_s15 = sceil.f32 %s199_s8 }
 0x150   : > { %204 = sst [smem:[#allocation3 + $0x1]] %s200_s15  ;;  %v205_v18 = vstv %s200_s15 }
 0x151   : > { %207 = vst.msk [vmem:[#allocation8] sm:$0x1] %vm206_vm0, %v205_v18 }
 0x152 PF: > { %p362_p6 = scmp.ne.s32.totalorder %s558_s9, 1 }
 0x153   : > { %s363_s16 = sld [smem:[#allocation3 + $0x1]] (!%p362_p6)  ;;  %v227_v25 = vld [vmem:[#allocation4] sm:$0xff] (!%p362_p6)  ;;  %v228_v26 = vld [vmem:[#allocation4 + $0x8] sm:$0xff] (!%p362_p6) }
 0x154   : > { %211 = sbr.rel (%p362_p6) target bundleno = 422 (0x1a6), region = 44 }
 0x159   : > { %s364_s17 = sadd.f32 (!%p362_p6), -7.0, %s363_s16  ;;  %v221_v19 = vstv (!%p362_p6), %s363_s16 }
 0x15a   : > { %s217_s18 = ssub.f32 (!%p362_p6), 7.0, %s363_s16  ;;  %446 = vpow2.f32 (!%p362_p6), %v221_v19 }
 0x15b   : > { %v214_v20 = vstv %s364_s17 }
 0x15c   : > { %448 = vpow2.f32 %v214_v20  ;;  %v218_v21 = vstv %s217_s18 }
 0x15d   : > { %450 = vpow2.f32 %v218_v21 }
 0x164   : > { %v447_v22 = vpop.eup %446 }
 0x166   : > { %v449_v23 = vpop.eup %448 }
 0x167   : > { %v451_v24 = vpop.eup %450  ;;  %376 = vpush %v449_v23 }
 0x168   : > { %378 = vpush %v451_v24 }
 0x169   : > { %380 = vpush %v447_v22 }
 0x198   : > { %s377_s19 = spop %376 }
 0x199   : > { %s379_s9 = spop %378  ;;  %v234_v32 = vstv %s377_s19 }
 0x19a   : > { %v229_v27 = vstv %s379_s9  ;;  %s381_s20 = spop %380 }
 0x19b   : > { %v230_v28 = vmul.f32 %v229_v27, %v227_v25  ;;  %v231_v29 = vmul.f32 %v229_v27, %v228_v26  ;;  %s224_s21 = ssub.f32 0.0, %s381_s20 }
 0x19d   : > { %v382_v30 = vround.rtne.f32 %v230_v28  ;;  %v383_v31 = vround.rtne.f32 %v231_v29  ;;  %s225_s22 = ssub.f32 0.0, %s224_s21  ;;  %v237_v35 = vstv %s224_s21 }
 0x19f   : > { %v235_v33 = vmul.f32 %v382_v30, %v234_v32  ;;  %v236_v34 = vmul.f32 %v383_v31, %v234_v32  ;;  %s226_s23 = ssub.f32 %s225_s22, %s377_s19 }
 0x1a1   : > { %v238_v36 = vmax.f32 %v237_v35, %v235_v33  ;;  %v239_v37 = vmax.f32 %v237_v35, %v236_v34  ;;  %v240_v38 = vstv %s226_s23 }
 0x1a3   : > { %v241_v39 = vmin.f32 %v240_v38, %v238_v36  ;;  %v242_v40 = vmin.f32 %v240_v38, %v239_v37 }
 0x1a5   : > { %243 = vst [vmem:[#allocation7] sm:$0xff] %v241_v39  ;;  %244 = vst [vmem:[#allocation7 + $0x8] sm:$0xff] %v242_v40 }
 0x1a6 PF: > { %p659_p8 = scmp.eq.s32.totalorder %s354_s12, 1  ;;  %s573_s25 = smov [#allocation7]  }
 0x1a7   : > { %s260_s26 = sshll.u32 %s573_s25, 4  ;;  %s261_s26 = int_to_ptr.vmem [resolvable:$true] %s260_s26 }
 0x1a8   : > { %s480_s27 = scalar_lea.vmem %s261_s26, 256  ;;  %s486_s28 = scalar_lea.vmem %s261_s26, 512 }
 0x1a9   : > { %p481_p10 = scmp.ne.s32.totalorder %s261_s26, %s480_s27  ;;  %p487_p13 = scmp.lt.s32.totalorder %s261_s26, %s261_s26 }
 0x1aa   : > { %p488_p0 = scmp.lt.s32.totalorder %s486_s28, %s480_s27 }
 0x1ab   : > { %p482_p11 = pnand %p481_p10, %p659_p8 }
 0x1ac   : > { %p489_p1 = por %p488_p0, %p487_p13 }
 0x1ad   : > { %p483_p12 = pneg %p482_p11 }
 0x1af   : > { %p490_p2 = pnand %p489_p1, %p483_p12 }
 0x1b1   : > { %493 = shalt.err (!%p490_p2)
}
 0x1b2   : > { %s494_s30 = scalar_lea.hbm %s716_s1, 256 }
 0x1b3   : > { %p495_p5 = scmp.ne.s32.totalorder %s716_s1, %s494_s30  ;;  %p500_p3 = scmp.lt.u32.totalorder %s494_s30, %s716_s1 }
 0x1b5   : > { %p496_p7 = pnand %p495_p5, %p659_p8 }
 0x1b7   : > { %p497_p9 = pneg %p496_p7 }
 0x1b9   : > { %p502_p4 = pnand %p500_p3, %p497_p9 }
 0x1bb   : > { %505 = shalt.err (!%p502_p4)
}
 0x1bc   : > { %s574_s7 = smov 128   ;;  %s575_s8 = smov 8  }
 0x1bd   : > { %389 = dma.vmem_to_hbm [thread:$0]  (%p659_p8), %s261_s26, 256, %s716_s1, [#allocation6], %s574_s7, %s574_s7, %s575_s8  }
 0x1be   : > { %s576_s17 = smov [#allocation8]  }
 0x1bf   : > { %s274_s18 = sshll.u32 %s576_s17, 4  ;;  %s275_s18 = int_to_ptr.vmem [resolvable:$true] %s274_s18 }
 0x1c0   : > { %s506_s19 = scalar_lea.vmem %s275_s18, 16  ;;  %s512_s9 = scalar_lea.vmem %s275_s18, 32 }
 0x1c1   : > { %p507_p6 = scmp.ne.s32.totalorder %s275_s18, %s506_s19  ;;  %p513_p12 = scmp.lt.s32.totalorder %s275_s18, %s275_s18 }
 0x1c2   : > { %p514_p13 = scmp.lt.s32.totalorder %s512_s9, %s506_s19 }
 0x1c3   : > { %p508_p10 = pnand %p507_p6, %p659_p8 }
 0x1c4   : > { %p515_p0 = por %p514_p13, %p513_p12 }
 0x1c5   : > { %p509_p11 = pneg %p508_p10 }
 0x1c7   : > { %p516_p1 = pnand %p515_p0, %p509_p11 }
 0x1c9   : > { %519 = shalt.err (!%p516_p1)
}
 0x1ca   : > { %s520_s22 = scalar_lea.hbm %s717_s2, 16 }
 0x1cb   : > { %p521_p2 = scmp.ne.s32.totalorder %s717_s2, %s520_s22  ;;  %p526_p9 = scmp.lt.u32.totalorder %s520_s22, %s717_s2 }
 0x1cd   : > { %p522_p5 = pnand %p521_p2, %p659_p8 }
 0x1cf   : > { %p523_p7 = pneg %p522_p5 }
 0x1d1   : > { %p528_p3 = pnand %p526_p9, %p523_p7 }
 0x1d3   : > { %531 = shalt.err (!%p528_p3)
}
 0x1d4   : > { %391 = dma.vmem_to_hbm [thread:$0]  (%p659_p8), %s275_s18, 16, %s717_s2, [#allocation9]  }
 0x1d5   : > { %549 = dma.done.wait (%p659_p8), [#allocation9], 16  }
 0x1d6   : > { %551 = vsyncadd (%p659_p8), [#allocation9], 4294967280 }
 0x1d7 PF: > { %p409_p4 = scmp.ge.s32.totalorder %s566_s11, 2  ;;  %p410_p6 = scmp.eq.s32.totalorder %s355_s13, 1 }
 0x1d9   : > { %p401_p10 = pnand %p410_p6, %p409_p4 }
 0x1db   : > { %553 = dma.done.wait (!%p401_p10), [#allocation6], 256  }
 0x1dc   : > { %555 = vsyncadd (!%p401_p10), [#allocation6], 4294967040  ;;  %s18_s11 = sadd.s32 1, %s566_s11   ;;  %s727_s9 = smov %s562_s10 }
 0x1dd   : > { %p15_p11 = scmp.ge.s32.totalorder %s18_s11, 4   ;;  %s728_s10 = smov %s730_s14 }
 0x1df   :  { %17 = sbr.rel (!%p15_p11) target bundleno = 5 (0x5), region = 88 }
 0x1e6   :  { %296 = vsyncpa [#allocation5], 1 }
 0x1e7   :  { %298 = vsyncpa [#allocation5 + $0x1], 1 }
 0x1e8   :  { %299 = vsyncpa [#allocation6], 1 }
 0x1e9   :  { %301 = vsyncpa [#allocation6 + $0x1], 1 }
 0x1ea   :  { %302 = vsyncpa [#allocation9], 1 }

</bundles_post_ra>
